<compile_context>
chip_gen: v6e
topology: v6e:2x2x1
jax: 0.10.0
libtpu: 0.0.40
codegen_flags: <defaults>
</compile_context>

<pallas_src>
import functools
import math

import jax
import jax.numpy as jnp
from jax.experimental import pallas as pl
from jax.experimental.pallas import tpu as pltpu


def _round_up(x, m):
    return ((x + m - 1) // m) * m


def _cdiv(a, b):
    return -(-a // b)


# ----------------------------- Pallas kernel ------------------------------ #

def _prober_kernel(*refs, n_layers):
    """Fused MLP tile: x -> [Linear + ReLU] * (n_layers-1) -> Linear.

    refs = (x_ref, w0, b0, w1, b1, ..., o_ref).  Weights/biases use a constant
    block index (single-buffered, DMA'd once, VMEM-resident across grid
    steps); intermediate activations live only in VMEM/vregs.
    """
    x_ref = refs[0]
    o_ref = refs[-1]
    # x arrives as raw f32; cast to bf16 in-kernel for the MXU (no separate
    # wrapper-side pad/convert dispatch).
    h = x_ref[...].astype(jnp.bfloat16)              # (tm, K0) bf16
    for i in range(n_layers):
        w_ref = refs[1 + 2 * i]
        b_ref = refs[2 + 2 * i]
        # bf16 MXU matmul, f32 accumulation.
        y = jnp.dot(h, w_ref[...], preferred_element_type=jnp.float32)
        y = y + b_ref[...]                           # bias add in f32 (VPU)
        if i < n_layers - 1:
            y = jnp.maximum(y, 0.0)                  # ReLU in f32
            h = y.astype(jnp.bfloat16)               # back to bf16 for next MXU
        else:
            o_ref[...] = y.astype(o_ref.dtype)


# ------------------------------ JAX glue ---------------------------------- #

def init_params(key, embedding, arch, output_shape):
    """Parameters matching torch Prober(embedding, arch, output_shape).

    Returns raw f32 (in, out) weights/biases (for reference checking) plus the
    kernel-ready form: layer-0 weight keeps unpadded K (= embedding); all
    output-feature dims (and subsequent K dims) are zero-padded to multiples
    of 128.  Weights are stored bf16, biases f32 as (1, N) rows.
    """
    output_dim = int(math.prod(output_shape))
    arch_list = [int(a) for a in arch.split("-")] if arch != "" else []
    f = [embedding] + arch_list + [output_dim]

    raw = []
    weights, biases = [], []
    keys = jax.random.split(key, 2 * (len(f) - 1))
    for i in range(len(f) - 1):
        fan_in, fan_out = f[i], f[i + 1]
        bound = 1.0 / math.sqrt(fan_in)              # ~ nn.Linear default init
        w = jax.random.uniform(keys[2 * i], (fan_in, fan_out), jnp.float32,
                               -bound, bound)
        b = jax.random.uniform(keys[2 * i + 1], (fan_out,), jnp.float32,
                               -bound, bound)
        raw.append((w, b))

        # Layer 0 keeps raw K (matches the unpadded f32 input); later layers'
        # K must match the previous layer's lane-padded output width.
        k_dim = fan_in if i == 0 else _round_up(fan_in, 128)
        n_pad = _round_up(fan_out, 128)
        w_p = jnp.pad(w, ((0, k_dim - fan_in), (0, n_pad - fan_out)))
        b_p = jnp.pad(b, (0, n_pad - fan_out))
        weights.append(w_p.astype(jnp.bfloat16))
        biases.append(b_p.reshape(1, n_pad).astype(jnp.float32))

    return {
        "raw": raw,
        "weights": weights,
        "biases": biases,
        "in_dim": embedding,
        "out_dim": output_dim,
    }


def prober_forward(params, e):
    """e: (..., embedding) f32.  Returns (..., output_dim) f32."""
    ws = params["weights"]
    bs = params["biases"]
    out_dim = params["out_dim"]
    n_layers = len(ws)

    lead = e.shape[:-1]
    d_in = e.shape[-1]
    d_out_pad = ws[-1].shape[1]

    M = int(math.prod(lead)) if lead else 1
    x = e.reshape(M, d_in)

    # Row tiling: one grid step for small M (latency-bound regime; the step
    # overhead dominates otherwise).  For large M use 512-row tiles: multiple
    # of 256 (v6e/v7x MXU M-dim), 128 (v5e) and 16 (bf16 sublanes), and ~85%
    # of HBM roofline in measured pipelining efficiency.
    if M <= 512:
        tm, grid_m = M, 1
    else:
        tm = 512
        grid_m = _cdiv(M, tm)
        x = jnp.pad(x, ((0, grid_m * tm - M), (0, 0)))
    m_pad = grid_m * tm

    # ---- specs / operands -------------------------------------------------
    # x: raw f32, full-K block (legal: K equals the array dim), double-buffered
    #    only when there is more than one grid step.
    in_specs = [pl.BlockSpec((tm, d_in), lambda i: (i, 0))]
    operands = [x]
    resident = pl.Buffered(1)                        # weights/biases never refill
    for w, b in zip(ws, bs):
        kd, nd = w.shape
        in_specs.append(
            pl.BlockSpec((kd, nd), lambda i: (0, 0), pipeline_mode=resident))
        in_specs.append(
            pl.BlockSpec((1, nd), lambda i: (0, 0), pipeline_mode=resident))
        operands.append(w)
        operands.append(b)
    out_spec = pl.BlockSpec((tm, d_out_pad), lambda i: (i, 0))

    # ---- VMEM residency budget (explicit vmem_limit_bytes) -----------------
    dbuf = 2 if grid_m > 1 else 1
    w_bytes = sum(int(w.size) * 2 for w in ws)       # bf16, single-buffered
    b_bytes = sum(int(b.size) * 4 for b in bs)       # f32, single-buffered
    x_bytes = tm * d_in * 4 * dbuf
    o_bytes = tm * d_out_pad * 4 * dbuf
    act_bytes = tm * max(int(w.shape[1]) for w in ws) * (4 + 2)  # f32 + bf16 working set
    budget = w_bytes + b_bytes + x_bytes + o_bytes + 2 * act_bytes
    vmem_limit = int(min(64 * 1024 * 1024, max(16 * 1024 * 1024, 2 * budget)))

    flops = int(2 * m_pad * sum(int(w.shape[0]) * int(w.shape[1]) for w in ws))
    bytes_accessed = int(x.size * 4 + w_bytes + b_bytes + m_pad * d_out_pad * 4)

    out = pl.pallas_call(
        functools.partial(_prober_kernel, n_layers=n_layers),
        out_shape=jax.ShapeDtypeStruct((m_pad, d_out_pad), jnp.float32),
        grid=(grid_m,),
        in_specs=in_specs,
        out_specs=out_spec,
        compiler_params=pltpu.CompilerParams(
            # "parallel" only matters on v7x megacore and only when each core
            # gets a full-size tile; with one grid step it is moot.
            dimension_semantics=(("parallel",) if grid_m > 1 else ("arbitrary",)),
            vmem_limit_bytes=vmem_limit,
        ),
        cost_estimate=pl.CostEstimate(
            flops=flops, transcendentals=0, bytes_accessed=bytes_accessed),
    )(*operands)

    # Strip row / lane padding and restore leading dims.
    if m_pad != M:
        out = out[:M]
    return out[:, :out_dim].reshape(*lead, out_dim)


def prober_reference(params, e):
    """Plain-JAX f32 reference (mirrors the PyTorch Sequential exactly)."""
    raw = params["raw"]
    h = e
    for i, (w, b) in enumerate(raw):
        h = jnp.dot(h, w, precision=jax.lax.Precision.HIGHEST) + b
        if i < len(raw) - 1:
            h = jnp.maximum(h, 0.0)
    return h


# -------------------------------- main ------------------------------------ #

if __name__ == "__main__":
    # Prober(embedding=64, arch="128-64", output_shape=[4, 4]) -> output_dim 16.
    B, T, embedding = 4, 8, 64
    arch = "128-64"
    output_shape = [4, 4]

    e = jax.random.normal(jax.random.PRNGKey(0), (B, T, embedding), jnp.float32)
    params = init_params(jax.random.PRNGKey(42), embedding, arch, output_shape)

    fwd = jax.jit(functools.partial(prober_forward, params))
    out = fwd(e)
    jax.block_until_ready(out)

    assert out.shape == (B, T, int(math.prod(output_shape))), out.shape
    assert bool(jnp.all(jnp.isfinite(out)))

    # Tolerance check vs f32 reference (kernel uses bf16 MXU operands).
    ref = prober_reference(params, e)
    max_err = float(jnp.max(jnp.abs(out - ref)))
    assert max_err < 5e-2, max_err

    print("KERNEL_OK")
</pallas_src>

<mosaic_0001>
module attributes {stable_mosaic.version = 11 : i64} {
  func.func @_prober_kernel(%arg0: i32, %arg1: memref<32x64xf32, #tpu.memory_space<vmem>>, %arg2: memref<64x128xbf16, #tpu.memory_space<vmem>>, %arg3: memref<1x128xf32, #tpu.memory_space<vmem>>, %arg4: memref<128x128xbf16, #tpu.memory_space<vmem>>, %arg5: memref<1x128xf32, #tpu.memory_space<vmem>>, %arg6: memref<128x128xbf16, #tpu.memory_space<vmem>>, %arg7: memref<1x128xf32, #tpu.memory_space<vmem>>, %arg8: memref<32x128xf32, #tpu.memory_space<vmem>>) attributes {dimension_semantics = [#tpu.dimension_semantics<arbitrary>], iteration_bounds = array<i64: 1>, scalar_prefetch = 0 : i64, scratch_operands = 0 : i64, tpu.core_type = #tpu.core_type<tc>, window_params = [{transform_indices = @transform_0, window_bounds = array<i64: 32, 64>}, {pipeline_mode = #tpu.pipeline_mode<synchronous>, transform_indices = @transform_1, window_bounds = array<i64: 64, 128>}, {pipeline_mode = #tpu.pipeline_mode<synchronous>, transform_indices = @transform_2, window_bounds = array<i64: 1, 128>}, {pipeline_mode = #tpu.pipeline_mode<synchronous>, transform_indices = @transform_3, window_bounds = array<i64: 128, 128>}, {pipeline_mode = #tpu.pipeline_mode<synchronous>, transform_indices = @transform_4, window_bounds = array<i64: 1, 128>}, {pipeline_mode = #tpu.pipeline_mode<synchronous>, transform_indices = @transform_5, window_bounds = array<i64: 128, 128>}, {pipeline_mode = #tpu.pipeline_mode<synchronous>, transform_indices = @transform_6, window_bounds = array<i64: 1, 128>}, {transform_indices = @transform_7, window_bounds = array<i64: 32, 128>}]} {
    %c0 = arith.constant 0 : index
    %c0_0 = arith.constant 0 : index
    %0 = vector.load %arg1[%c0, %c0_0] : memref<32x64xf32, #tpu.memory_space<vmem>>, vector<32x64xf32>
    %1 = arith.truncf %0 : vector<32x64xf32> to vector<32x64xbf16>
    %c0_1 = arith.constant 0 : index
    %c0_2 = arith.constant 0 : index
    %2 = vector.load %arg2[%c0_1, %c0_2] : memref<64x128xbf16, #tpu.memory_space<vmem>>, vector<64x128xbf16>
    %cst = arith.constant dense<0.000000e+00> : vector<32x128xf32>
    %3 = tpu.matmul %1, %2, %cst {dimension_numbers = #tpu.dot_dimension_numbers<[1], [0], [0], [1], [0, 0, 1, 1], [], []>} : vector<32x64xbf16>, vector<64x128xbf16>, vector<32x128xf32> -> vector<32x128xf32>
    %c0_3 = arith.constant 0 : index
    %c0_4 = arith.constant 0 : index
    %4 = vector.load %arg3[%c0_3, %c0_4] : memref<1x128xf32, #tpu.memory_space<vmem>>, vector<1x128xf32>
    %5 = vector.broadcast %4 : vector<1x128xf32> to vector<32x128xf32>
    %6 = arith.addf %3, %5 : vector<32x128xf32>
    %cst_5 = arith.constant 0.000000e+00 : f32
    %7 = vector.broadcast %cst_5 : f32 to vector<32x128xf32>
    %8 = arith.maximumf %6, %7 : vector<32x128xf32>
    %9 = arith.truncf %8 : vector<32x128xf32> to vector<32x128xbf16>
    %c0_6 = arith.constant 0 : index
    %c0_7 = arith.constant 0 : index
    %10 = vector.load %arg4[%c0_6, %c0_7] : memref<128x128xbf16, #tpu.memory_space<vmem>>, vector<128x128xbf16>
    %cst_8 = arith.constant dense<0.000000e+00> : vector<32x128xf32>
    %11 = tpu.matmul %9, %10, %cst_8 {dimension_numbers = #tpu.dot_dimension_numbers<[1], [0], [0], [1], [0, 0, 1, 1], [], []>} : vector<32x128xbf16>, vector<128x128xbf16>, vector<32x128xf32> -> vector<32x128xf32>
    %c0_9 = arith.constant 0 : index
    %c0_10 = arith.constant 0 : index
    %12 = vector.load %arg5[%c0_9, %c0_10] : memref<1x128xf32, #tpu.memory_space<vmem>>, vector<1x128xf32>
    %13 = vector.broadcast %12 : vector<1x128xf32> to vector<32x128xf32>
    %14 = arith.addf %11, %13 : vector<32x128xf32>
    %cst_11 = arith.constant 0.000000e+00 : f32
    %15 = vector.broadcast %cst_11 : f32 to vector<32x128xf32>
    %16 = arith.maximumf %14, %15 : vector<32x128xf32>
    %17 = arith.truncf %16 : vector<32x128xf32> to vector<32x128xbf16>
    %c0_12 = arith.constant 0 : index
    %c0_13 = arith.constant 0 : index
    %18 = vector.load %arg6[%c0_12, %c0_13] : memref<128x128xbf16, #tpu.memory_space<vmem>>, vector<128x128xbf16>
    %cst_14 = arith.constant dense<0.000000e+00> : vector<32x128xf32>
    %19 = tpu.matmul %17, %18, %cst_14 {dimension_numbers = #tpu.dot_dimension_numbers<[1], [0], [0], [1], [0, 0, 1, 1], [], []>} : vector<32x128xbf16>, vector<128x128xbf16>, vector<32x128xf32> -> vector<32x128xf32>
    %c0_15 = arith.constant 0 : index
    %c0_16 = arith.constant 0 : index
    %20 = vector.load %arg7[%c0_15, %c0_16] : memref<1x128xf32, #tpu.memory_space<vmem>>, vector<1x128xf32>
    %21 = vector.broadcast %20 : vector<1x128xf32> to vector<32x128xf32>
    %22 = arith.addf %19, %21 : vector<32x128xf32>
    %c0_17 = arith.constant 0 : index
    %c0_18 = arith.constant 0 : index
    %23 = vector.load %arg8[%c0_17, %c0_18] : memref<32x128xf32, #tpu.memory_space<vmem>>, vector<32x128xf32>
    tpu.vector_store %arg8[%c0_17, %c0_18], %22 {strides = array<i32>} : memref<32x128xf32, #tpu.memory_space<vmem>>, vector<32x128xf32>,
    return
  }
  func.func @transform_0(%arg0: i32) -> (i32, i32) {
    %c0_i32 = arith.constant 0 : i32
    %c0_i32_0 = arith.constant 0 : i32
    return %arg0, %c0_i32 : i32, i32
  }
  func.func @transform_1(%arg0: i32) -> (i32, i32) {
    %c0_i32 = arith.constant 0 : i32
    %c0_i32_0 = arith.constant 0 : i32
    %c0_i32_1 = arith.constant 0 : i32
    return %c0_i32, %c0_i32_0 : i32, i32
  }
  func.func @transform_2(%arg0: i32) -> (i32, i32) {
    %c0_i32 = arith.constant 0 : i32
    %c0_i32_0 = arith.constant 0 : i32
    %c0_i32_1 = arith.constant 0 : i32
    return %c0_i32, %c0_i32_0 : i32, i32
  }
  func.func @transform_3(%arg0: i32) -> (i32, i32) {
    %c0_i32 = arith.constant 0 : i32
    %c0_i32_0 = arith.constant 0 : i32
    %c0_i32_1 = arith.constant 0 : i32
    return %c0_i32, %c0_i32_0 : i32, i32
  }
  func.func @transform_4(%arg0: i32) -> (i32, i32) {
    %c0_i32 = arith.constant 0 : i32
    %c0_i32_0 = arith.constant 0 : i32
    %c0_i32_1 = arith.constant 0 : i32
    return %c0_i32, %c0_i32_0 : i32, i32
  }
  func.func @transform_5(%arg0: i32) -> (i32, i32) {
    %c0_i32 = arith.constant 0 : i32
    %c0_i32_0 = arith.constant 0 : i32
    %c0_i32_1 = arith.constant 0 : i32
    return %c0_i32, %c0_i32_0 : i32, i32
  }
  func.func @transform_6(%arg0: i32) -> (i32, i32) {
    %c0_i32 = arith.constant 0 : i32
    %c0_i32_0 = arith.constant 0 : i32
    %c0_i32_1 = arith.constant 0 : i32
    return %c0_i32, %c0_i32_0 : i32, i32
  }
  func.func @transform_7(%arg0: i32) -> (i32, i32) {
    %c0_i32 = arith.constant 0 : i32
    %c0_i32_0 = arith.constant 0 : i32
    return %arg0, %c0_i32 : i32, i32
  }
}

</mosaic_0001>

<bundles_post_ra>
// kernel: prober_forward.1
= control target key start
LH: loop header
LB: loop body
LE: loop exit
PB: predicated region body
PF: predicated region fallthrough
CT: control target
= control target key end

     0   :  { %12 = vsyncpa [#allocation3], 0  ;;  %s755_s0 = inlined_call_operand.hbm [shape: f32[32,64], index: 0, kind: input, shape index: {}]   ;;  %s756_s1 = inlined_call_operand.hbm [shape: bf16[64,128], index: 1, kind: input, shape index: {}]   ;;  %s757_s2 = inlined_call_operand.vmem [shape: f32[1,128], index: 2, kind: input, shape index: {}]   ;;  %s758_s3 = inlined_call_operand.hbm [shape: bf16[128,128], index: 3, kind: input, shape index: {}]   ;;  %s759_s4 = inlined_call_operand.vmem [shape: f32[1,128], index: 4, kind: input, shape index: {}]   ;;  %s760_s5 = inlined_call_operand.hbm [shape: bf16[128,128], index: 5, kind: input, shape index: {}]   ;;  %s761_s6 = inlined_call_operand.vmem [shape: f32[1,128], index: 6, kind: input, shape index: {}]   ;;  %s762_s7 = inlined_call_operand.vmem [shape: f32[32,128], index: 7, kind: output, shape index: {}]  }
   0x1   :  { %13 = vsyncpa [#allocation5], 0 }
   0x2   :  { %14 = vsyncpa [#allocation8], 0  ;;  %s663_s24 = smov [#allocation4]  }
   0x3   :  { %s32_s25 = sshll.u32 %s663_s24, 4  ;;  %s33_s25 = int_to_ptr.vmem [resolvable:$true] %s32_s25 }
   0x4   :  { %s585_s26 = scalar_lea.vmem %s33_s25, 512  ;;  %p590_p1 = scmp.lt.s32.totalorder %s33_s25, %s33_s25 }
   0x5   :  { %p586_p0 = scmp.ne.s32.totalorder %s33_s25, %s585_s26  ;;  %p591_p2 = scmp.lt.s32.totalorder %s585_s26, %s585_s26 }
   0x7   :  { %p592_p3 = por %p591_p2, %p590_p1 }
   0x9   :  { %p593_p4 = pnand %p592_p3, %p586_p0 }
   0xb   :  { %596 = shalt.err (!%p593_p4)
}
   0xc   :  { %s664_s27 = smov 64   ;;  %s665_s28 = smov 4  }
   0xd   :  { %38 = dma.hbm_to_vmem [thread:$0]  %s756_s1, 512, %s33_s25, [#allocation5], %s664_s27, %s664_s27, %s665_s28  }
   0xe   :  { %s666_s8 = smov [#allocation2]  }
   0xf   :  { %s20_s9 = sshll.u32 %s666_s8, 4  ;;  %s21_s9 = int_to_ptr.vmem [resolvable:$true] %s20_s9 }
  0x10   :  { %s605_s10 = scalar_lea.vmem %s21_s9, 512  ;;  %p610_p6 = scmp.lt.s32.totalorder %s21_s9, %s21_s9 }
  0x11   :  { %p606_p5 = scmp.ne.s32.totalorder %s21_s9, %s605_s10  ;;  %p611_p7 = scmp.lt.s32.totalorder %s605_s10, %s605_s10 }
  0x13   :  { %p612_p8 = por %p611_p7, %p610_p6 }
  0x15   :  { %p613_p9 = pnand %p612_p8, %p606_p5 }
  0x17   :  { %616 = shalt.err (!%p613_p9)
}
  0x18   :  { %s667_s11 = smov 128   ;;  %s668_s12 = smov 8  }
  0x19   :  { %26 = dma.hbm_to_vmem [thread:$0]  %s755_s0, 512, %s21_s9, [#allocation3], %s667_s11, %s667_s11, %s668_s12  }
  0x1a   :  { %s669_s15 = smov [#allocation6]   ;;  %s670_s17 = smov [#allocation7]  }
  0x1b   :  { %s46_s16 = sshll.u32 %s669_s15, 4  ;;  %s60_s1 = sshll.u32 %s670_s17, 4  ;;  %s47_s16 = int_to_ptr.vmem [resolvable:$true] %s46_s16  ;;  %s61_s1 = int_to_ptr.vmem [resolvable:$true] %s60_s1 }
  0x1c   :  { %s625_s18 = scalar_lea.vmem %s47_s16, 1024  ;;  %p630_p11 = scmp.lt.s32.totalorder %s47_s16, %s47_s16 }
  0x1d   :  { %p626_p10 = scmp.ne.s32.totalorder %s47_s16, %s625_s18  ;;  %p631_p12 = scmp.lt.s32.totalorder %s625_s18, %s625_s18 }
  0x1f   :  { %p632_p13 = por %p631_p12, %p630_p11 }
  0x21   :  { %p633_p0 = pnand %p632_p13, %p626_p10 }
  0x23   :  { %636 = shalt.err (!%p633_p0)
}
  0x24   :  { %52 = dma.hbm_to_vmem [thread:$0]  %s758_s3, 1024, %s47_s16, [#allocation5], %s664_s27, %s664_s27, %s665_s28  }
  0x25   :  { %s645_s0 = scalar_lea.vmem %s61_s1, 1024  ;;  %p650_p2 = scmp.lt.s32.totalorder %s61_s1, %s61_s1 }
  0x26   :  { %p646_p1 = scmp.ne.s32.totalorder %s61_s1, %s645_s0  ;;  %p651_p3 = scmp.lt.s32.totalorder %s645_s0, %s645_s0 }
  0x28   :  { %p652_p4 = por %p651_p3, %p650_p2 }
  0x2a   :  { %p653_p5 = pnand %p652_p4, %p646_p1 }
  0x2c   :  { %656 = shalt.err (!%p653_p5)
}
  0x2d   :  { %66 = dma.hbm_to_vmem [thread:$0]  %s760_s5, 1024, %s61_s1, [#allocation8], %s664_s27, %s664_s27, %s665_s28  }
  0x2e   :  { %657 = dma.done.wait [#allocation3], 512  }
  0x2f   :  { %658 = vsyncadd [#allocation3], 4294966784 }
  0x30   :  { %659 = dma.done.wait [#allocation5], 1536  }
  0x31   :  { %660 = vsyncadd [#allocation5], 4294965760 }
  0x32   :  { %661 = dma.done.wait [#allocation8], 1024  }
  0x33   :  { %662 = vsyncadd [#allocation8], 4294966272  ;;  %v557_v0 = vld [vmem:[#allocation4 + $0x18] sm:$0xff]   ;;  %v558_v1 = vld [vmem:[#allocation4 + $0x10] sm:$0xff]   ;;  %vm127_vm0 = vcmask 523264  }
  0x34   :  { %497 = vmatprep.subr.bf16.mxu0 %v557_v0  ;;  %v559_v2 = vld [vmem:[#allocation4 + $0x8] sm:$0xff]   ;;  %v82_v3 = vld [vmem:[#allocation2] sm:$0xff]  ;;  %v561_v6 = vld [vmem:[#allocation6 + $0x38] sm:$0xff]  }
  0x35   :  { %498 = vmatpush3.bf16.msra.mxu0 %v557_v0  ;;  %v83_v4 = vld [vmem:[#allocation2 + $0x8] sm:$0xff]  ;;  %v562_v7 = vld [vmem:[#allocation6 + $0x30] sm:$0xff]   ;;  %v560_v8 = vld [vmem:[#allocation4] sm:$0xff]   ;;  %509 = vmatprep.subr.bf16.mxu1 %v561_v6 }
  0x36   :  { %499 = vmatprep.subr.bf16.mxu0 %v558_v1  ;;  %v86_v5 = vpack.c.bf16 %v83_v4, %v82_v3  ;;  %v84_v9 = vld [vmem:[#allocation2 + $0x10] sm:$0xff]  ;;  %v85_v10 = vld [vmem:[#allocation2 + $0x18] sm:$0xff]  ;;  %510 = vmatpush3.bf16.msra.mxu1 %v561_v6  ;;  %v563_v11 = vld [vmem:[#allocation6 + $0x28] sm:$0xff]  }
  0x37   :  { %511 = vmatprep.subr.bf16.mxu1 %v562_v7  ;;  %v564_v12 = vld [vmem:[#allocation6 + $0x20] sm:$0xff]   ;;  %v87_v13 = vpack.c.bf16 %v85_v10, %v84_v9  ;;  %v565_v14 = vld [vmem:[#allocation6 + $0x18] sm:$0xff]   ;;  %v566_v15 = vld [vmem:[#allocation6 + $0x10] sm:$0xff]  }
  0x38   :  { %505 = vmatprep.mubr.msk.bf16.mxu0 %vm127_vm0, %v86_v5  ;;  %v567_v16 = vld [vmem:[#allocation6 + $0x8] sm:$0xff]   ;;  %v568_v17 = vld [vmem:[#allocation6] sm:$0xff]   ;;  %v569_v18 = vld [vmem:[#allocation7 + $0x38] sm:$0xff]  }
  0x39   :  { %500 = vmatpush3.bf16.msra.mxu0 %v558_v1  ;;  %v570_v19 = vld [vmem:[#allocation7 + $0x30] sm:$0xff]   ;;  %v571_v20 = vld [vmem:[#allocation7 + $0x28] sm:$0xff]   ;;  %v572_v21 = vld [vmem:[#allocation7 + $0x20] sm:$0xff]  }
  0x3a   :  { %501 = vmatprep.subr.bf16.mxu0 %v559_v2  ;;  %512 = vmatpush3.bf16.msra.mxu1 %v562_v7  ;;  %v573_v22 = vld [vmem:[#allocation7 + $0x18] sm:$0xff]   ;;  %v446_v25 = vld [vmem:[%s757_s2] ss:$0 sm:$0xff]  ;;  %v574_v38 = vld [vmem:[#allocation7 + $0x10] sm:$0xff]  }
  0x3b   :  { %513 = vmatprep.subr.bf16.mxu1 %v563_v11  ;;  %v575_v39 = vld [vmem:[#allocation7 + $0x8] sm:$0xff]   ;;  %v576_v40 = vld [vmem:[#allocation7] sm:$0xff]  }
  0x3c   :  { %v453_v43 = vld [vmem:[%s759_s4] ss:$0 sm:$0xff] }
  0x3d   :  { %502 = vmatpush3.bf16.msra.mxu0 %v559_v2  ;;  %v462_v56 = vld [vmem:[%s761_s6] ss:$0 sm:$0xff] }
  0x3e   :  { %503 = vmatprep.subr.bf16.mxu0 %v560_v8  ;;  %514 = vmatpush3.bf16.msra.mxu1 %v563_v11 }
  0x3f   :  { %515 = vmatprep.subr.bf16.mxu1 %v564_v12 }
  0x41   :  { %504 = vmatpush3.bf16.msra.mxu0 %v560_v8 }
  0x42   :  { %516 = vmatpush3.bf16.msra.mxu1 %v564_v12  ;;  %529 = vmatprep.subr.bf16.mxu0 %v569_v18 }
  0x43   :  { %517 = vmatprep.subr.bf16.mxu1 %v565_v14 }
  0x44   :  { %506 = vmatmul.mubr.msk.bf16.vlgmr.msra.gmra.mxu0 %vm127_vm0, %v87_v13 }
  0x45   :  { %530 = vmatpush3.bf16.msra.mxu0 %v569_v18 }
  0x46   :  { %518 = vmatpush3.bf16.msra.mxu1 %v565_v14  ;;  %531 = vmatprep.subr.bf16.mxu0 %v570_v19 }
  0x47   :  { %519 = vmatprep.subr.bf16.mxu1 %v566_v15 }
  0x49   :  { %532 = vmatpush3.bf16.msra.mxu0 %v570_v19 }
  0x4a   :  { %520 = vmatpush3.bf16.msra.mxu1 %v566_v15  ;;  %533 = vmatprep.subr.bf16.mxu0 %v571_v20 }
  0x4b   :  { %521 = vmatprep.subr.bf16.mxu1 %v567_v16 }
  0x4d   :  { %534 = vmatpush3.bf16.msra.mxu0 %v571_v20 }
  0x4e   :  { %522 = vmatpush3.bf16.msra.mxu1 %v567_v16  ;;  %535 = vmatprep.subr.bf16.mxu0 %v572_v21 }
  0x4f   :  { %523 = vmatprep.subr.bf16.mxu1 %v568_v17 }
  0x51   :  { %536 = vmatpush3.bf16.msra.mxu0 %v572_v21 }
  0x52   :  { %524 = vmatpush3.bf16.msra.mxu1 %v568_v17  ;;  %537 = vmatprep.subr.bf16.mxu0 %v573_v22 }
  0x55   :  { %538 = vmatpush3.bf16.msra.mxu0 %v573_v22 }
  0x56   :  { %539 = vmatprep.subr.bf16.mxu0 %v574_v38 }
  0x59   :  { %540 = vmatpush3.bf16.msra.mxu0 %v574_v38 }
  0x5a   :  { %541 = vmatprep.subr.bf16.mxu0 %v575_v39 }
  0x5d   :  { %542 = vmatpush3.bf16.msra.mxu0 %v575_v39 }
  0x5e   :  { %543 = vmatprep.subr.bf16.mxu0 %v576_v40 }
  0x61   :  { %544 = vmatpush3.bf16.msra.mxu0 %v576_v40 }
 0x104   :  { %v507_v23 = vpop.f32.mrf.mxu0 }
 0x105   :  { %v177_v29 = vadd.f32 %v507_v23, %v446_v25 }
 0x106   :  { %v168_v24 = vpop.f32.mrf.mxu0 }
 0x107   :  { %v169_v27 = vadd.f32 %v446_v25, %v168_v24  ;;  %v185_v35 = vmax.f32 %v177_v29, 0.0 }
 0x108   :  { %v508_v26 = vpop.f32.mrf.mxu0 }
 0x109   :  { %v180_v28 = vadd.f32 %v508_v26, %v446_v25  ;;  %v183_v33 = vmax.f32 %v169_v27, 0.0 }
 0x10a   :  { %v171_v30 = vpop.f32.mrf.mxu0 }
 0x10b   :  { %v172_v31 = vadd.f32 %v446_v25, %v171_v30  ;;  %v186_v32 = vmax.f32 %v180_v28, 0.0 }
 0x10d   :  { %v184_v34 = vmax.f32 %v172_v31, 0.0  ;;  %v188_v37 = vpack.c.bf16 %v186_v32, %v185_v35 }
 0x10f   :  { %v187_v36 = vpack.c.bf16 %v184_v34, %v183_v33 }
 0x111   :  { %525 = vmatprep.mubr.bf16.mxu1 %v187_v36 }
 0x112   :  { %526 = vmatmul.mubr.bf16.vlgmr.msra.gmra.mxu1 %v188_v37 }
 0x1d2   :  { %v527_v41 = vpop.f32.mrf.mxu1 }
 0x1d3   :  { %v303_v47 = vadd.f32 %v527_v41, %v453_v43 }
 0x1d4   :  { %v294_v42 = vpop.f32.mrf.mxu1 }
 0x1d5   :  { %v295_v45 = vadd.f32 %v453_v43, %v294_v42  ;;  %v311_v53 = vmax.f32 %v303_v47, 0.0 }
 0x1d6   :  { %v528_v44 = vpop.f32.mrf.mxu1 }
 0x1d7   :  { %v306_v46 = vadd.f32 %v528_v44, %v453_v43  ;;  %v309_v51 = vmax.f32 %v295_v45, 0.0 }
 0x1d8   :  { %v297_v48 = vpop.f32.mrf.mxu1 }
 0x1d9   :  { %v298_v49 = vadd.f32 %v453_v43, %v297_v48  ;;  %v312_v50 = vmax.f32 %v306_v46, 0.0 }
 0x1db   :  { %v310_v52 = vmax.f32 %v298_v49, 0.0  ;;  %v314_v55 = vpack.c.bf16 %v312_v50, %v311_v53 }
 0x1dd   :  { %v313_v54 = vpack.c.bf16 %v310_v52, %v309_v51 }
 0x1df   :  { %545 = vmatprep.mubr.bf16.mxu0 %v313_v54 }
 0x1e0   :  { %546 = vmatmul.mubr.bf16.vlgmr.msra.gmra.mxu0 %v314_v55 }
 0x2a0   :  { %v547_v57 = vpop.f32.mrf.mxu0 }
 0x2a1   :  { %v429_v58 = vadd.f32 %v547_v57, %v462_v56 }
 0x2a2   :  { %v420_v59 = vpop.f32.mrf.mxu0 }
 0x2a3   :  { %437 = vst [vmem:[%s762_s7 + $0x10] sm:$0xff] %v429_v58  ;;  %v421_v60 = vadd.f32 %v462_v56, %v420_v59 }
 0x2a4   :  { %v548_v61 = vpop.f32.mrf.mxu0 }
 0x2a5   :  { %435 = vst [vmem:[%s762_s7] sm:$0xff] %v421_v60  ;;  %v432_v62 = vadd.f32 %v548_v61, %v462_v56 }
 0x2a6   :  { %v423_v63 = vpop.f32.mrf.mxu0 }
 0x2a7   :  { %438 = vst [vmem:[%s762_s7 + $0x18] sm:$0xff] %v432_v62  ;;  %v424_v0 = vadd.f32 %v462_v56, %v423_v63 }
 0x2a9   :  { %436 = vst [vmem:[%s762_s7 + $0x8] sm:$0xff] %v424_v0 }
 0x2aa   :  { %443 = vsyncpa [#allocation3], 1 }
 0x2ab   :  { %444 = vsyncpa [#allocation5], 1 }
 0x2ac   :  { %445 = vsyncpa [#allocation8], 1 }

</bundles_post_ra>
